<compile_context>
chip_gen: v6e
topology: v6e:2x2x1
jax: 0.10.0
libtpu: 0.0.40
codegen_flags: <defaults>
</compile_context>

<pallas_src>
import functools

import jax
import jax.numpy as jnp
from jax.experimental import pallas as pl
from jax.experimental.pallas import tpu as pltpu


def _moving_avg_kernel(x_ref, o_ref, xpad_ref, *, kernel_size: int, stride: int,
                       pad: int):
    # x_ref:    (1, L, TC)      input tile (one batch element, one channel tile)
    # o_ref:    (1, L_out, TC)  output tile
    # xpad_ref: (1, L_pad, TC)  VMEM scratch holding the replicate-padded tile
    L = x_ref.shape[1]
    L_out = o_ref.shape[1]
    tc = x_ref.shape[2]

    xv = x_ref[...]                       # single load, kept in input dtype
    # Fused replicate padding: build the padded tile once in VMEM (no HBM copy).
    xpad_ref[:, pad:pad + L, :] = xv
    if pad > 0:
        xpad_ref[:, 0:pad, :] = jnp.broadcast_to(xv[:, 0:1, :], (1, pad, tc))
        xpad_ref[:, pad + L:, :] = jnp.broadcast_to(xv[:, L - 1:L, :], (1, pad, tc))

    xp = xpad_ref[...]                    # padded tile, still input dtype
    acc = jnp.zeros((1, L_out, tc), jnp.float32)
    # Unrolled window sum; each term is an offset (strided) time slice, upcast
    # per-term so no full-precision staging copy of the whole tile is held.
    for k in range(kernel_size):
        term = xp[:, k: k + stride * (L_out - 1) + 1: stride, :]
        acc = acc + term.astype(jnp.float32)
    o_ref[...] = (acc * (1.0 / kernel_size)).astype(o_ref.dtype)


def moving_avg(x: jax.Array, kernel_size: int, stride: int,
               *, max_block_bytes: int = 2 * 1024 * 1024) -> jax.Array:
    """Pallas implementation of the PyTorch moving_avg module forward pass."""
    B, L, C = x.shape
    pad = (kernel_size - 1) // 2
    L_pad = L + 2 * pad
    L_out = (L_pad - kernel_size) // stride + 1
    itemsize = jnp.dtype(x.dtype).itemsize

    # Channel tile: full C when one padded block fits the budget (or C is at
    # most one vreg of lanes); otherwise the largest 128-lane multiple that
    # keeps one padded block under the budget. Channels are independent of the
    # pooling axis, so no halo is needed.
    if C <= 128 or L_pad * C * itemsize <= max_block_bytes:
        tc = C
    else:
        tc = max(128, min(C, (max_block_bytes // (L_pad * itemsize)) // 128 * 128))
    n_ct = pl.cdiv(C, tc)
    # TODO(synk): add a time-tile (halo) grid axis for very long sequences with tiny C.

    kernel = functools.partial(
        _moving_avg_kernel, kernel_size=kernel_size, stride=stride, pad=pad
    )

    # Explicit VMEM budget: double-buffered input/output blocks + padded scratch
    # + f32 accumulator temporaries, with 2x headroom; floored at 16 MiB and
    # capped at 32 MiB so it is safe on v5e/v6e (128 MiB physical) and v7x
    # (64 MiB physical, 32 MiB default scoped).
    block_bytes = (L + L_out) * tc * itemsize * 2
    scratch_bytes = L_pad * tc * itemsize + 2 * L_out * tc * 4
    vmem_limit = int(min(32 * 1024 * 1024,
                         max(16 * 1024 * 1024, 2 * (block_bytes + scratch_bytes))))

    return pl.pallas_call(
        kernel,
        out_shape=jax.ShapeDtypeStruct((B, L_out, C), x.dtype),
        grid_spec=pltpu.PrefetchScalarGridSpec(
            num_scalar_prefetch=0,
            grid=(B, n_ct),
            in_specs=[pl.BlockSpec((1, L, tc), lambda b, c: (b, 0, c))],
            out_specs=pl.BlockSpec((1, L_out, tc), lambda b, c: (b, 0, c)),
            scratch_shapes=[pltpu.VMEM((1, L_pad, tc), x.dtype)],
        ),
        compiler_params=pltpu.CompilerParams(
            dimension_semantics=("parallel", "parallel"),
            vmem_limit_bytes=vmem_limit,
        ),
    )(x)


def _moving_avg_ref(x, kernel_size, stride):
    # Pure-JAX reference mirroring the PyTorch module (for correctness check).
    pad = (kernel_size - 1) // 2
    front = jnp.repeat(x[:, 0:1, :], pad, axis=1)
    end = jnp.repeat(x[:, -1:, :], pad, axis=1)
    xp = jnp.concatenate([front, x, end], axis=1)  # (B, L_pad, C)
    L_pad = xp.shape[1]
    L_out = (L_pad - kernel_size) // stride + 1
    windows = jnp.stack(
        [xp[:, t * stride: t * stride + kernel_size, :] for t in range(L_out)],
        axis=1,
    )  # (B, L_out, kernel_size, C)
    return jnp.mean(windows, axis=2)


if __name__ == "__main__":
    key = jax.random.PRNGKey(0)

    # Module-typical config: series decomposition with kernel_size=5, stride=1.
    B, L, C = 2, 8, 32
    kernel_size, stride = 5, 1
    x = jax.random.normal(key, (B, L, C), dtype=jnp.float32)

    out = jax.block_until_ready(moving_avg(x, kernel_size, stride))
    ref = _moving_avg_ref(x, kernel_size, stride)
    assert out.shape == ref.shape, (out.shape, ref.shape)
    assert jnp.allclose(out, ref, atol=1e-5, rtol=1e-5), "mismatch vs reference"

    # Second check that exercises the channel-tile grid axis (tc=128, 3 tiles).
    B2, L2, C2 = 2, 64, 384
    x2 = jax.random.normal(jax.random.PRNGKey(1), (B2, L2, C2), dtype=jnp.float32)
    out2 = jax.block_until_ready(
        moving_avg(x2, kernel_size, stride, max_block_bytes=16 * 1024)
    )
    ref2 = _moving_avg_ref(x2, kernel_size, stride)
    assert out2.shape == ref2.shape, (out2.shape, ref2.shape)
    assert jnp.allclose(out2, ref2, atol=1e-5, rtol=1e-5), "mismatch vs reference (tiled)"

    print("KERNEL_OK")
</pallas_src>

<mosaic_0001>
module attributes {stable_mosaic.version = 11 : i64} {
  func.func @_moving_avg_kernel(%arg0: i32, %arg1: i32, %arg2: memref<1x8x32xf32, #tpu.memory_space<vmem>>, %arg3: memref<1x8x32xf32, #tpu.memory_space<vmem>>, %arg4: memref<1x12x32xf32, #tpu.memory_space<vmem>>) attributes {dimension_semantics = [#tpu.dimension_semantics<parallel>, #tpu.dimension_semantics<parallel>], iteration_bounds = array<i64: 2, 1>, scalar_prefetch = 0 : i64, scratch_operands = 1 : i64, tpu.core_type = #tpu.core_type<tc>, window_params = [{transform_indices = @transform_0, window_bounds = array<i64: 1, 8, 32>}, {transform_indices = @transform_1, window_bounds = array<i64: 1, 8, 32>}]} {
    %c0 = arith.constant 0 : index
    %c0_0 = arith.constant 0 : index
    %c0_1 = arith.constant 0 : index
    %0 = vector.load %arg2[%c0, %c0_0, %c0_1] : memref<1x8x32xf32, #tpu.memory_space<vmem>>, vector<1x8x32xf32>
    %c0_2 = arith.constant 0 : index
    %c2 = arith.constant 2 : index
    %c0_3 = arith.constant 0 : index
    %1 = vector.load %arg4[%c0_2, %c2, %c0_3] : memref<1x12x32xf32, #tpu.memory_space<vmem>>, vector<1x8x32xf32>
    tpu.vector_store %arg4[%c0_2, %c2, %c0_3], %0 {strides = array<i32>} : memref<1x12x32xf32, #tpu.memory_space<vmem>>, vector<1x8x32xf32>,
    %2 = vector.extract_strided_slice %0 {offsets = [0, 0, 0], sizes = [1, 1, 32], strides = [1, 1, 1]} : vector<1x8x32xf32> to vector<1x1x32xf32>
    %3 = vector.shape_cast %2 : vector<1x1x32xf32> to vector<1x1x32xf32>
    %4 = vector.broadcast %3 : vector<1x1x32xf32> to vector<1x2x32xf32>
    %c0_4 = arith.constant 0 : index
    %c0_5 = arith.constant 0 : index
    %c0_6 = arith.constant 0 : index
    %5 = vector.load %arg4[%c0_4, %c0_5, %c0_6] : memref<1x12x32xf32, #tpu.memory_space<vmem>>, vector<1x2x32xf32>
    tpu.vector_store %arg4[%c0_4, %c0_5, %c0_6], %4 {strides = array<i32>} : memref<1x12x32xf32, #tpu.memory_space<vmem>>, vector<1x2x32xf32>,
    %6 = vector.extract_strided_slice %0 {offsets = [0, 7, 0], sizes = [1, 1, 32], strides = [1, 1, 1]} : vector<1x8x32xf32> to vector<1x1x32xf32>
    %7 = vector.shape_cast %6 : vector<1x1x32xf32> to vector<1x1x32xf32>
    %8 = vector.broadcast %7 : vector<1x1x32xf32> to vector<1x2x32xf32>
    %c0_7 = arith.constant 0 : index
    %c10 = arith.constant 10 : index
    %c0_8 = arith.constant 0 : index
    %9 = vector.load %arg4[%c0_7, %c10, %c0_8] : memref<1x12x32xf32, #tpu.memory_space<vmem>>, vector<1x2x32xf32>
    tpu.vector_store %arg4[%c0_7, %c10, %c0_8], %8 {strides = array<i32>} : memref<1x12x32xf32, #tpu.memory_space<vmem>>, vector<1x2x32xf32>,
    %c0_9 = arith.constant 0 : index
    %c0_10 = arith.constant 0 : index
    %c0_11 = arith.constant 0 : index
    %10 = vector.load %arg4[%c0_9, %c0_10, %c0_11] : memref<1x12x32xf32, #tpu.memory_space<vmem>>, vector<1x12x32xf32>
    %cst = arith.constant 0.000000e+00 : f32
    %11 = vector.broadcast %cst : f32 to vector<1x8x32xf32>
    %12 = vector.extract_strided_slice %10 {offsets = [0, 0, 0], sizes = [1, 8, 32], strides = [1, 1, 1]} : vector<1x12x32xf32> to vector<1x8x32xf32>
    %13 = arith.addf %11, %12 : vector<1x8x32xf32>
    %14 = vector.extract_strided_slice %10 {offsets = [0, 1, 0], sizes = [1, 8, 32], strides = [1, 1, 1]} : vector<1x12x32xf32> to vector<1x8x32xf32>
    %15 = arith.addf %13, %14 : vector<1x8x32xf32>
    %16 = vector.extract_strided_slice %10 {offsets = [0, 2, 0], sizes = [1, 8, 32], strides = [1, 1, 1]} : vector<1x12x32xf32> to vector<1x8x32xf32>
    %17 = arith.addf %15, %16 : vector<1x8x32xf32>
    %18 = vector.extract_strided_slice %10 {offsets = [0, 3, 0], sizes = [1, 8, 32], strides = [1, 1, 1]} : vector<1x12x32xf32> to vector<1x8x32xf32>
    %19 = arith.addf %17, %18 : vector<1x8x32xf32>
    %20 = vector.extract_strided_slice %10 {offsets = [0, 4, 0], sizes = [1, 8, 32], strides = [1, 1, 1]} : vector<1x12x32xf32> to vector<1x8x32xf32>
    %21 = arith.addf %19, %20 : vector<1x8x32xf32>
    %cst_12 = arith.constant 2.000000e-01 : f32
    %22 = vector.broadcast %cst_12 : f32 to vector<1x8x32xf32>
    %23 = arith.mulf %21, %22 : vector<1x8x32xf32>
    %c0_13 = arith.constant 0 : index
    %c0_14 = arith.constant 0 : index
    %c0_15 = arith.constant 0 : index
    %24 = vector.load %arg3[%c0_13, %c0_14, %c0_15] : memref<1x8x32xf32, #tpu.memory_space<vmem>>, vector<1x8x32xf32>
    tpu.vector_store %arg3[%c0_13, %c0_14, %c0_15], %23 {strides = array<i32>} : memref<1x8x32xf32, #tpu.memory_space<vmem>>, vector<1x8x32xf32>,
    return
  }
  func.func @transform_0(%arg0: i32, %arg1: i32) -> (i32, i32, i32) {
    %c0_i32 = arith.constant 0 : i32
    %c0_i32_0 = arith.constant 0 : i32
    return %arg0, %c0_i32, %arg1 : i32, i32, i32
  }
  func.func @transform_1(%arg0: i32, %arg1: i32) -> (i32, i32, i32) {
    %c0_i32 = arith.constant 0 : i32
    %c0_i32_0 = arith.constant 0 : i32
    return %arg0, %c0_i32, %arg1 : i32, i32, i32
  }
}

</mosaic_0001>

<bundles_post_ra>
// kernel: tpu_custom_call.1
= control target key start
LH: loop header
LB: loop body
LE: loop exit
PB: predicated region body
PF: predicated region fallthrough
CT: control target
= control target key end

     0   :  { %6 = vsyncpa [#allocation4], 0  ;;  %s626_s0 = inlined_call_operand.hbm [shape: f32[2,8,32], index: 0, kind: input, shape index: {}]   ;;  %s627_s1 = inlined_call_operand.hbm [shape: f32[2,8,32], index: 1, kind: output, shape index: {}]  }
   0x1   :  { %8 = vsyncpa [#allocation4 + $0x1], 0 }
   0x2   :  { %9 = vsyncpa [#allocation5], 0 }
   0x3   :  { %11 = vsyncpa [#allocation5 + $0x1], 0  ;;  %s486_s6 = smov 0   ;;  %s488_s7 = smov 0  }
   0x4   :  { %s490_s8 = smov 0   ;;  %s492_s9 = smov 0  }
   0x5   :  { %s494_s10 = smov 0   ;;  %s496_s11 = smov 0  }
   0x6 LB: > { %s289_s12 = sadd.s32 4294967295, %s472_s11   ;;  %s290_s13 = sadd.s32 4294967294, %s472_s11   ;;  %s472_s11 = sphi %s496_s11, %s17_s11   ;;  %s468_s10 = sphi %s494_s10, %s639_s10   ;;  %s464_s9 = sphi %s492_s9, %s638_s9   ;;  %s460_s8 = sphi %s490_s8, %s637_s8   ;;  %s456_s7 = sphi %s488_s7, %s636_s7   ;;  %s452_s6 = sphi %s486_s6, %s635_s6  }
   0x7   : > { %s29_s14 = sadd.s32 1, %s468_s10  ;;  %s38_s15 = sadd.s32 1, %s460_s8 }
   0x8   : > { %p31_p0 = scmp.ge.s32.totalorder %s29_s14, 2  ;;  %p45_p1 = scmp.ne.s32.totalorder %s460_s8, %s456_s7 }
   0x9   : > { %p46_p2 = scmp.eq.s32.totalorder %s472_s11, 0  ;;  %p51_p3 = scmp.ne.s32.totalorder %s456_s7, %s452_s6 }
   0xa   : > { %s641_s14 = smov (%p31_p0, %s29_s14), 0  ;;  %p52_p5 = scmp.eq.s32.totalorder %s289_s12, 0 }
   0xb   : > { %p527_p4 = por %p46_p2, %p45_p1  ;;  %s33_s17 = ssub.s32 %s468_s10, %s641_s14 }
   0xc   : > { %p77_p6 = scmp.eq.s32.totalorder %s289_s12, 1  ;;  %p36_p7 = scmp.eq.s32.totalorder %s33_s17, 0 }
   0xd   : > { %p533_p8 = por %p52_p5, %p51_p3  ;;  %p83_p10 = scmp.eq.s32.totalorder %s290_s13, 1 }
   0xe   : > { %p537_p9 = por %p77_p6, %p45_p1  ;;  %p314_p13 = scmp.lt.s32.totalorder %s472_s11, 2 }
   0xf   : > { %s542_s20 = scalar_select %p36_p7, %s460_s8, %s38_s15  }
  0x10   : > { %p544_p11 = por %p83_p10, %p51_p3  ;;  %s103_s22 = sand.u32 1, %s460_s8  }
  0x11   : > { %s293_s23 = sshll.u32 %s103_s22, 3  ;;  %s294_s24 = sshll.u32 %s468_s10, 7 }
  0x12   : > { %s631_s21 = scalar_select %p544_p11, 1, 0 }
  0x13   : > { %s113_s27 = scalar_lea.hbm %s626_s0, %s294_s24  ;;  %s107_s28 = scalar_lea.vmem [#allocation3], %s293_s23 }
  0x14   : > { %s115_s29 = sshll.u32 %s107_s28, 4  ;;  %p557_p0 = pnand %p314_p13, %p527_p4  ;;  %s116_s29 = int_to_ptr.vmem [resolvable:$true] %s115_s29 }
  0x15   : > { %p295_p1 = scmp.ge.s32.totalorder %s472_s11, 1  ;;  %p120_p2 = scmp.lt.s32.totalorder %s472_s11, 3 }
  0x16   : > { %s104_s2 = scalar_lea.sflag [#allocation4], %s103_s22  ;;  %p366_p3 = pneg %p557_p0 }
  0x17   : > { %s377_s3 = scalar_lea.vmem %s116_s29, 128  ;;  %s474_s4 = smov [#allocation3]  }
  0x18   : > { %p378_p5 = scmp.ne.s32.totalorder %s116_s29, %s377_s3  ;;  %s382_s5 = sshll.u32 %s474_s4, 4  ;;  %s383_s5 = int_to_ptr.vmem [resolvable:$false] %s382_s5 }
  0x19   : > { %s384_s12 = scalar_lea.vmem %s383_s5, 256  ;;  %p385_p10 = scmp.lt.s32.totalorder %s116_s29, %s383_s5 }
  0x1a   : > { %p380_p6 = pnand %p378_p5, %p366_p3  ;;  %p386_p12 = scmp.lt.s32.totalorder %s384_s12, %s377_s3 }
  0x1c   : > { %p381_p7 = pneg %p380_p6  ;;  %p387_p4 = por %p386_p12, %p385_p10 }
  0x1e   : > { %p388_p13 = pnand %p387_p4, %p381_p7 }
  0x20   : > { %391 = shalt.err (!%p388_p13)
}
  0x21   : > { %309 = dma.hbm_to_vmem [thread:$0]  (!%p557_p0), %s113_s27, 128, %s116_s29, %s104_s2  }
  0x22   : > { %p121_p11 = pnand %p295_p1, %p120_p2 }
  0x23   : > { %s572_s13 = sand.u32 (!%p121_p11), 1, %s456_s7  }
  0x24   : > { %124 = sbr.rel (%p121_p11) target bundleno = 84 (0x54), region = 24  ;;  %s296_s15 = sshll.u32 (!%p121_p11), %s572_s13, 3 }
  0x25   : > { %s127_s16 = scalar_lea.sflag (!%p121_p11), [#allocation4], %s572_s13  ;;  %s130_s17 = scalar_lea.vmem (!%p121_p11), [#allocation3], %s296_s15 }
  0x29   : > { %443 = dma.done.wait (%p533_p8), %s127_s16, 128  }
  0x2a   : > { %445 = vsyncadd (%p533_p8), %s127_s16, 4294967168  ;;  %v152_v0 = vlaneseq  ;;  %vm150_vm0 = vcmask 261120   ;;  %v149_v4 = vld [vmem:[%s130_s17] sm:$0xff]  ;;  %vm156_vm1 = vcmask 254976   ;;  %vm168_vm2 = vcmask 1046528   ;;  %s148_s18 = scalar_lea.vmem [#allocation6], %s296_s15 }
  0x2b   : > { %151 = vst.msk [vmem:[#allocation2 + $0x2] sm:$0xff] %vm150_vm0, %v149_v4  ;;  %vm174_vm3 = vcmask 1045504   ;;  %vm180_vm4 = vcmask 1044480   ;;  %vm186_vm5 = vcmask 1043456   ;;  %s209_s22 = sshll.u32 %s148_s18, 4  ;;  %s299_s23 = sshll.u32 %s464_s9, 7  ;;  %s210_s22 = int_to_ptr.vmem [resolvable:$true] %s209_s22 }
  0x2c   : > { %v153_v1 = vshrl.u32 %v152_v0, 7  ;;  %s207_s26 = scalar_lea.hbm %s627_s1, %s299_s23  ;;  %s195_s27 = scalar_lea.sflag [#allocation5], %s572_s13 }
  0x2d   : > { %s392_s28 = scalar_lea.vmem %s210_s22, 128  ;;  %s475_s29 = smov [#allocation6]  }
  0x2e   : > { %v154_v2 = vsub.s32 0, %v153_v1  ;;  %v160_v3 = vsub.s32 7, %v153_v1  ;;  %p393_p8 = scmp.ne.s32.totalorder %s210_s22, %s392_s28  ;;  %s396_s30 = sshll.u32 %s475_s29, 4  ;;  %s397_s30 = int_to_ptr.vmem [resolvable:$false] %s396_s30 }
  0x2f   : > { %s398_s2 = scalar_lea.vmem %s397_s30, 256  ;;  %p399_p0 = scmp.lt.s32.totalorder %s210_s22, %s397_s30 }
  0x30   : > { %v155_v5 = vrot.slane %v149_v4, %v154_v2  ;;  %v161_v6 = vrot.slane %v149_v4, %v160_v3  ;;  %p394_p11 = pnand %p393_p8, %p537_p9  ;;  %p400_p1 = scmp.lt.s32.totalorder %s398_s2, %s392_s28 }
  0x32   : > { %157 = vst.msk [vmem:[#allocation2] sm:$0x3] %vm156_vm1, %v155_v5  ;;  %162 = vst.msk [vmem:[#allocation2 + $0xa] sm:$0x3] %vm156_vm1, %v161_v6  ;;  %p395_p12 = pneg %p394_p11  ;;  %p401_p2 = por %p400_p1, %p399_p0 }
  0x34   : > { %p402_p3 = pnand %p401_p2, %p395_p12 }
  0x39   : > { %v163_v7 = vld [vmem:[#allocation2] sm:$0xff]  ;;  %v164_v8 = vld [vmem:[#allocation2 + $0x8] sm:$0xf] }
  0x3a   : > { %v169_v9 = vrot.slane %v163_v7, 1  ;;  %v170_v10 = vrot.slane %v164_v8, 1  ;;  %v175_v11 = vrot.slane %v163_v7, 2  ;;  %v176_v12 = vrot.slane %v164_v8, 2 }
  0x3b   : > { %v181_v14 = vrot.slane %v163_v7, 3  ;;  %v182_v15 = vrot.slane %v164_v8, 3  ;;  %v187_v18 = vrot.slane %v163_v7, 4  ;;  %v188_v19 = vrot.slane %v164_v8, 4 }
  0x3c   : > { %v171_v13 = vsel %vm168_vm2, %v169_v9, %v170_v10  ;;  %v177_v17 = vsel %vm174_vm3, %v175_v11, %v176_v12 }
  0x3d   : > { %v173_v16 = vadd.f32 %v171_v13, %v163_v7  ;;  %v183_v21 = vsel %vm180_vm4, %v181_v14, %v182_v15  ;;  %v189_v23 = vsel %vm186_vm5, %v187_v18, %v188_v19 }
  0x3f   : > { %v179_v20 = vadd.f32 %v177_v17, %v173_v16 }
  0x41   : > { %v185_v22 = vadd.f32 %v183_v21, %v179_v20 }
  0x43   : > { %v191_v24 = vadd.f32 %v189_v23, %v185_v22 }
  0x45   : > { %v192_v25 = vmul.f32 0.2, %v191_v24 }
  0x47   : > { %193 = vst.msk [vmem:[%s148_s18] sm:$0xff] %vm150_vm0, %v192_v25 }
  0x48   : > { %405 = shalt.err (!%p402_p3)
}
  0x49   : > { %s406_s9 = scalar_lea.hbm %s207_s26, 128  ;;  %s410_s5 = scalar_lea.hbm %s627_s1, 256 }
  0x4a   : > { %p407_p5 = scmp.ne.s32.totalorder %s207_s26, %s406_s9  ;;  %p411_p10 = scmp.lt.s32.totalorder %s207_s26, %s627_s1 }
  0x4b   : > { %p412_p4 = scmp.lt.s32.totalorder %s410_s5, %s406_s9 }
  0x4c   : > { %p408_p6 = pnand %p407_p5, %p537_p9 }
  0x4d   : > { %p413_p13 = por %p412_p4, %p411_p10 }
  0x4e   : > { %p409_p7 = pneg %p408_p6 }
  0x50   : > { %p414_p8 = pnand %p413_p13, %p409_p7 }
  0x52   : > { %417 = shalt.err (!%p414_p8)
}
  0x53   : > { %304 = dma.vmem_to_hbm [thread:$0]  (%p537_p9), %s210_s22, 128, %s207_s26, %s195_s27  }
  0x54 PF: > { %s221_s15 = sand.u32 1, %s452_s6   ;;  %p633_p11 = scmp.ne.s32.totalorder %s631_s21, 0 }
  0x55   : > { %p634_p12 = scmp.ge.s32.totalorder %s472_s11, 2  ;;  %s222_s16 = scalar_lea.sflag [#allocation5], %s221_s15 }
  0x57   : > { %p311_p0 = pnand %p634_p12, %p633_p11 }
  0x59   : > { %p312_p1 = pneg %p311_p0 }
  0x5b   : > { %447 = dma.done.wait (%p312_p1), %s222_s16, 128  }
  0x5c   : > { %449 = vsyncadd (%p312_p1), %s222_s16, 4294967168  ;;  %s17_s11 = sadd.s32 1, %s472_s11   ;;  %s635_s6 = smov %s456_s7 }
  0x5d   : > { %p14_p2 = scmp.ge.s32.totalorder %s17_s11, 4   ;;  %s636_s7 = smov %s460_s8 }
  0x5e   : > { %s637_s8 = smov %s542_s20  ;;  %s638_s9 = smov %s468_s10 }
  0x5f   : > { %s639_s10 = smov %s641_s14  ;;  %16 = sbr.rel (!%p14_p2) target bundleno = 6 (0x6), region = 69 }
  0x64   :  { %227 = vsyncpa [#allocation4], 1 }
  0x65   :  { %229 = vsyncpa [#allocation4 + $0x1], 1 }
  0x66   :  { %230 = vsyncpa [#allocation5], 1 }
  0x67   :  { %232 = vsyncpa [#allocation5 + $0x1], 1 }

</bundles_post_ra>
